<compile_context>
chip_gen: v7x
topology: tpu7x:2x2x1
jax: 0.10.0
libtpu: 0.0.40
codegen_flags: <defaults>
</compile_context>

<pallas_src>
import math
import functools

import jax
import jax.numpy as jnp
from jax.experimental import pallas as pl
from jax.experimental.pallas import tpu as pltpu


def _self_attn_kernel(qkv_ref, mask_ref, w_ref, b_ref, o_ref, *,
                      batch, seq, num_heads, head_dim, inv_scale):
    f32 = jnp.float32
    bf16 = jnp.bfloat16
    H = num_heads * head_dim
    BS = batch * seq                       # folded-batch row count

    def linear(x_bf16, widx):
        # bf16 MXU dot, f32 accumulation, f32 bias add. Weight slices are
        # static sublane-aligned views of the packed (5H, H) weight ref.
        w = w_ref[widx * H:(widx + 1) * H, :]          # (H, H) bf16
        b = b_ref[widx:widx + 1, :]                    # (1, H) f32
        return jnp.dot(x_bf16, w, preferred_element_type=f32) + b

    # Projections over the whole (B*S, H) slab (batch folded).
    qp = linear(qkv_ref[0 * BS:1 * BS, :], 0)          # q_proj(q)          (BS, H) f32
    kp = linear(qkv_ref[1 * BS:2 * BS, :], 1)          # k_proj(k)
    vp = linear(qkv_ref[2 * BS:3 * BS, :], 2)          # v_proj(v)
    rp = linear(qp.astype(bf16), 3)                    # r_proj(q_proj(q)), gate, f32

    # Fold 1/sqrt(head_dim) into q once (rp above saw the unscaled qp).
    qs = (qp * inv_scale).astype(bf16)
    kb = kp.astype(bf16)
    vb = vp.astype(bf16)

    # Head-stack: (BS, H) -> (num_heads*BS, D).  Row order: h*BS + b*S + s,
    # i.e. group g = h*batch + b occupies rows [g*seq, (g+1)*seq).  This must
    # match the block-diagonal mask built in the wrapper.
    def head_stack(x):
        return jnp.concatenate(
            [x[:, h * head_dim:(h + 1) * head_dim] for h in range(num_heads)],
            axis=0)

    q_st = head_stack(qs)                              # (G*S, D) bf16
    k_st = head_stack(kb)
    v_st = head_stack(vb)

    # All (head, batch) score blocks in ONE NT matmul (no explicit transpose).
    scores = jax.lax.dot_general(
        q_st, k_st,
        dimension_numbers=(((1,), (1,)), ((), ())),
        preferred_element_type=f32)                    # (G*S, G*S) f32

    # Block-diagonal + user mask, as a finite select (no -inf NaN hazard).
    scores = jnp.where(mask_ref[...] != 0, scores, f32(-1e30))

    # One softmax over all stacked rows (valid columns live inside each row's
    # own diagonal block; masked/cross-block entries underflow to 0 in exp).
    m_row = jnp.max(scores, axis=-1, keepdims=True)
    e = jnp.exp(scores - m_row)
    denom = jnp.sum(e, axis=-1, keepdims=True)
    probs = e * pl.reciprocal(denom, approx=True)      # EUP recip, no VPU divide
    # TODO(synk): nn.Dropout on attn_probs treated as identity (eval mode).

    pv = jnp.dot(probs.astype(bf16), v_st,
                 preferred_element_type=f32)           # (G*S, D) f32

    # Gate by r (f32) and accumulate each head straight into the output
    # projection: out = sum_h (pv_h * r_h) @ Wo[h*D:(h+1)*D, :].
    # pv_h is a sublane slice (free view); only the r gate needs lane slices.
    out = jnp.zeros((BS, H), f32)
    for h in range(num_heads):
        lo = h * head_dim
        hi = lo + head_dim
        oh = pv[h * BS:(h + 1) * BS, :] * rp[:, lo:hi]             # (BS, D) f32
        out = out + jnp.dot(oh.astype(bf16),
                            w_ref[4 * H + lo:4 * H + hi, :],
                            preferred_element_type=f32)
    o_ref[...] = (out + b_ref[4:5, :]).astype(o_ref.dtype)


def self_attention_pallas(q, k, v, attn_mask, params, num_heads):
    B, S, H = q.shape
    D = H // num_heads
    BS = B * S
    G = num_heads * B
    GS = G * S
    inv_scale = 1.0 / math.sqrt(D)
    out_dtype = q.dtype
    bf16 = jnp.bfloat16

    wq, bq, wk, bk, wv, bv, wr, br, wo, bo = params

    # Pack activations / weights / biases (layout plumbing only, done once):
    #   qkv   : (3*B*S, H) bf16    (halves HBM->VMEM bytes for MXU operands)
    #   w_all : (5*H, H)   bf16    order [q, k, v, r, o]
    #   b_all : (5, H)     f32
    qkv = jnp.concatenate(
        [q.reshape(BS, H), k.reshape(BS, H), v.reshape(BS, H)], axis=0
    ).astype(bf16)
    w_all = jnp.concatenate([wq, wk, wv, wr, wo], axis=0).astype(bf16)
    b_all = jnp.concatenate([bq, bk, bv, br, bo], axis=0).astype(jnp.float32)

    # Block-diagonal (head, batch)-stacked "allowed" mask, int8 (4x smaller
    # DMA than f32).  Group order g = h*B + b matches head_stack() in-kernel.
    m = (attn_mask != 0)                                        # (B, S, S)
    m_g = jnp.broadcast_to(m[None], (num_heads, B, S, S)).reshape(G, S, S)
    eye_g = jnp.eye(G, dtype=bool)
    allowed = (eye_g[:, None, :, None] & m_g[:, :, None, :]).reshape(GS, GS)
    allowed = allowed.astype(jnp.int8)

    kernel = functools.partial(_self_attn_kernel, batch=B, seq=S,
                               num_heads=num_heads, head_dim=D,
                               inv_scale=inv_scale)

    out = pl.pallas_call(
        kernel,
        out_shape=jax.ShapeDtypeStruct((BS, H), out_dtype),
        grid=(1,),                                   # whole problem fused in one step
        in_specs=[
            pl.BlockSpec((3 * BS, H), lambda i: (0, 0)),
            pl.BlockSpec((GS, GS), lambda i: (0, 0)),
            pl.BlockSpec((5 * H, H), lambda i: (0, 0)),
            pl.BlockSpec((5, H), lambda i: (0, 0)),
        ],
        out_specs=pl.BlockSpec((BS, H), lambda i: (0, 0)),
        compiler_params=pltpu.CompilerParams(
            dimension_semantics=("arbitrary",),
        ),
    )(qkv, allowed, w_all, b_all)

    return out.reshape(B, S, H)


def _reference(q, k, v, attn_mask, params, num_heads):
    """Pure-JAX f32 replica of the PyTorch forward (dropout = identity)."""
    wq, bq, wk, bk, wv, bv, wr, br, wo, bo = params
    B, S, H = q.shape
    D = H // num_heads
    scale = math.sqrt(D)

    def lin(x, w, b):
        return x @ w + b[0]

    qp = lin(q, wq, bq)
    kp = lin(k, wk, bk)
    vp = lin(v, wv, bv)
    rp = lin(qp, wr, br)

    def split(x):  # (B,S,H) -> (B,N,S,D)
        return x.reshape(B, S, num_heads, D).transpose(0, 2, 1, 3)

    qh, kh, vh, rh = split(qp), split(kp), split(vp), split(rp)
    scores = jnp.einsum('bnqd,bnkd->bnqk', qh, kh) / scale
    scores = jnp.where(attn_mask[:, None, :, :] == 0, -jnp.inf, scores)
    probs = jax.nn.softmax(scores, axis=-1)
    x = jnp.einsum('bnqk,bnkd->bnqd', probs, vh) * rh
    x = x.transpose(0, 2, 1, 3).reshape(B, S, H)
    return lin(x, wo, bo)


if __name__ == "__main__":
    B, S, H, N = 2, 16, 32, 4      # batch, seq, hidden, heads  (head_dim = 8)

    key = jax.random.PRNGKey(0)
    ks = jax.random.split(key, 14)

    q = jax.random.normal(ks[0], (B, S, H), dtype=jnp.float32)
    k = jax.random.normal(ks[1], (B, S, H), dtype=jnp.float32)
    v = jax.random.normal(ks[2], (B, S, H), dtype=jnp.float32)

    # Causal mask (no fully-masked rows), broadcast over heads.
    causal = jnp.tril(jnp.ones((S, S), dtype=jnp.float32))
    attn_mask = jnp.broadcast_to(causal, (B, S, S))

    # nn.Linear params: weight stored as (in, out) (pre-transposed), bias as (1, out).
    def make_linear(kw, kb, fan_in, fan_out):
        bound = 1.0 / math.sqrt(fan_in)
        w = jax.random.uniform(kw, (fan_in, fan_out), jnp.float32, -bound, bound)
        b = jax.random.uniform(kb, (1, fan_out), jnp.float32, -bound, bound)
        return w, b

    wq, bq = make_linear(ks[3], ks[4], H, H)
    wk, bk = make_linear(ks[5], ks[6], H, H)
    wv, bv = make_linear(ks[7], ks[8], H, H)
    wr, br = make_linear(ks[9], ks[10], H, H)
    wo, bo = make_linear(ks[11], ks[12], H, H)
    params = (wq, bq, wk, bk, wv, bv, wr, br, wo, bo)

    out = self_attention_pallas(q, k, v, attn_mask, params, num_heads=N)
    out = jax.block_until_ready(out)

    ref = _reference(q, k, v, attn_mask, params, num_heads=N)
    assert out.shape == (B, S, H)
    # bf16 MXU operands + approx reciprocal -> compare against f32 reference
    # with a bf16-appropriate tolerance.
    assert jnp.allclose(out, ref, atol=5e-2, rtol=5e-2), "mismatch vs reference"

    print("KERNEL_OK")
</pallas_src>

<mosaic_0001>
module attributes {stable_mosaic.version = 11 : i64} {
  func.func @_self_attn_kernel(%arg0: i32, %arg1: memref<96x32xbf16, #tpu.memory_space<vmem>>, %arg2: memref<128x128xi8, #tpu.memory_space<vmem>>, %arg3: memref<160x32xbf16, #tpu.memory_space<vmem>>, %arg4: memref<5x32xf32, #tpu.memory_space<vmem>>, %arg5: memref<32x32xf32, #tpu.memory_space<vmem>>) attributes {dimension_semantics = [#tpu.dimension_semantics<arbitrary>], iteration_bounds = array<i64: 1>, scalar_prefetch = 0 : i64, scratch_operands = 0 : i64, tpu.core_type = #tpu.core_type<tc>, window_params = [{pipeline_mode = #tpu.pipeline_mode<synchronous>, transform_indices = @transform_0, window_bounds = array<i64: 96, 32>}, {pipeline_mode = #tpu.pipeline_mode<synchronous>, transform_indices = @transform_1, window_bounds = array<i64: 128, 128>}, {pipeline_mode = #tpu.pipeline_mode<synchronous>, transform_indices = @transform_2, window_bounds = array<i64: 160, 32>}, {pipeline_mode = #tpu.pipeline_mode<synchronous>, transform_indices = @transform_3, window_bounds = array<i64: 5, 32>}, {pipeline_mode = #tpu.pipeline_mode<synchronous>, transform_indices = @transform_4, window_bounds = array<i64: 32, 32>}]} {
    %c0 = arith.constant 0 : index
    %c0_0 = arith.constant 0 : index
    %0 = vector.load %arg1[%c0, %c0_0] : memref<96x32xbf16, #tpu.memory_space<vmem>>, vector<32x32xbf16>
    %c0_1 = arith.constant 0 : index
    %c0_2 = arith.constant 0 : index
    %1 = vector.load %arg3[%c0_1, %c0_2] : memref<160x32xbf16, #tpu.memory_space<vmem>>, vector<32x32xbf16>
    %c0_3 = arith.constant 0 : index
    %c0_4 = arith.constant 0 : index
    %2 = vector.load %arg4[%c0_3, %c0_4] : memref<5x32xf32, #tpu.memory_space<vmem>>, vector<1x32xf32>
    %cst = arith.constant dense<0.000000e+00> : vector<32x32xf32>
    %3 = tpu.matmul %0, %1, %cst {dimension_numbers = #tpu.dot_dimension_numbers<[1], [0], [0], [1], [0, 0, 1, 1], [], []>} : vector<32x32xbf16>, vector<32x32xbf16>, vector<32x32xf32> -> vector<32x32xf32>
    %4 = vector.broadcast %2 : vector<1x32xf32> to vector<32x32xf32>
    %5 = arith.addf %3, %4 : vector<32x32xf32>
    %c32 = arith.constant 32 : index
    %c0_5 = arith.constant 0 : index
    %6 = vector.load %arg1[%c32, %c0_5] : memref<96x32xbf16, #tpu.memory_space<vmem>>, vector<32x32xbf16>
    %c32_6 = arith.constant 32 : index
    %c0_7 = arith.constant 0 : index
    %7 = vector.load %arg3[%c32_6, %c0_7] : memref<160x32xbf16, #tpu.memory_space<vmem>>, vector<32x32xbf16>
    %c1 = arith.constant 1 : index
    %c0_8 = arith.constant 0 : index
    %8 = vector.load %arg4[%c1, %c0_8] : memref<5x32xf32, #tpu.memory_space<vmem>>, vector<1x32xf32>
    %cst_9 = arith.constant dense<0.000000e+00> : vector<32x32xf32>
    %9 = tpu.matmul %6, %7, %cst_9 {dimension_numbers = #tpu.dot_dimension_numbers<[1], [0], [0], [1], [0, 0, 1, 1], [], []>} : vector<32x32xbf16>, vector<32x32xbf16>, vector<32x32xf32> -> vector<32x32xf32>
    %10 = vector.broadcast %8 : vector<1x32xf32> to vector<32x32xf32>
    %11 = arith.addf %9, %10 : vector<32x32xf32>
    %c64 = arith.constant 64 : index
    %c0_10 = arith.constant 0 : index
    %12 = vector.load %arg1[%c64, %c0_10] : memref<96x32xbf16, #tpu.memory_space<vmem>>, vector<32x32xbf16>
    %c64_11 = arith.constant 64 : index
    %c0_12 = arith.constant 0 : index
    %13 = vector.load %arg3[%c64_11, %c0_12] : memref<160x32xbf16, #tpu.memory_space<vmem>>, vector<32x32xbf16>
    %c2 = arith.constant 2 : index
    %c0_13 = arith.constant 0 : index
    %14 = vector.load %arg4[%c2, %c0_13] : memref<5x32xf32, #tpu.memory_space<vmem>>, vector<1x32xf32>
    %cst_14 = arith.constant dense<0.000000e+00> : vector<32x32xf32>
    %15 = tpu.matmul %12, %13, %cst_14 {dimension_numbers = #tpu.dot_dimension_numbers<[1], [0], [0], [1], [0, 0, 1, 1], [], []>} : vector<32x32xbf16>, vector<32x32xbf16>, vector<32x32xf32> -> vector<32x32xf32>
    %16 = vector.broadcast %14 : vector<1x32xf32> to vector<32x32xf32>
    %17 = arith.addf %15, %16 : vector<32x32xf32>
    %18 = arith.truncf %5 : vector<32x32xf32> to vector<32x32xbf16>
    %c96 = arith.constant 96 : index
    %c0_15 = arith.constant 0 : index
    %19 = vector.load %arg3[%c96, %c0_15] : memref<160x32xbf16, #tpu.memory_space<vmem>>, vector<32x32xbf16>
    %c3 = arith.constant 3 : index
    %c0_16 = arith.constant 0 : index
    %20 = vector.load %arg4[%c3, %c0_16] : memref<5x32xf32, #tpu.memory_space<vmem>>, vector<1x32xf32>
    %cst_17 = arith.constant dense<0.000000e+00> : vector<32x32xf32>
    %21 = tpu.matmul %18, %19, %cst_17 {dimension_numbers = #tpu.dot_dimension_numbers<[1], [0], [0], [1], [0, 0, 1, 1], [], []>} : vector<32x32xbf16>, vector<32x32xbf16>, vector<32x32xf32> -> vector<32x32xf32>
    %22 = vector.broadcast %20 : vector<1x32xf32> to vector<32x32xf32>
    %23 = arith.addf %21, %22 : vector<32x32xf32>
    %cst_18 = arith.constant 0.353553385 : f32
    %24 = vector.broadcast %cst_18 : f32 to vector<32x32xf32>
    %25 = arith.mulf %5, %24 : vector<32x32xf32>
    %26 = arith.truncf %25 : vector<32x32xf32> to vector<32x32xbf16>
    %27 = arith.truncf %11 : vector<32x32xf32> to vector<32x32xbf16>
    %28 = arith.truncf %17 : vector<32x32xf32> to vector<32x32xbf16>
    %29 = vector.extract_strided_slice %26 {offsets = [0, 0], sizes = [32, 8], strides = [1, 1]} : vector<32x32xbf16> to vector<32x8xbf16>
    %30 = vector.extract_strided_slice %26 {offsets = [0, 8], sizes = [32, 8], strides = [1, 1]} : vector<32x32xbf16> to vector<32x8xbf16>
    %31 = vector.extract_strided_slice %26 {offsets = [0, 16], sizes = [32, 8], strides = [1, 1]} : vector<32x32xbf16> to vector<32x8xbf16>
    %32 = vector.extract_strided_slice %26 {offsets = [0, 24], sizes = [32, 8], strides = [1, 1]} : vector<32x32xbf16> to vector<32x8xbf16>
    %33 = tpu.concatenate %29, %30, %31, %32 in 0 : vector<32x8xbf16>, vector<32x8xbf16>, vector<32x8xbf16>, vector<32x8xbf16> -> vector<128x8xbf16>
    %34 = vector.extract_strided_slice %27 {offsets = [0, 0], sizes = [32, 8], strides = [1, 1]} : vector<32x32xbf16> to vector<32x8xbf16>
    %35 = vector.extract_strided_slice %27 {offsets = [0, 8], sizes = [32, 8], strides = [1, 1]} : vector<32x32xbf16> to vector<32x8xbf16>
    %36 = vector.extract_strided_slice %27 {offsets = [0, 16], sizes = [32, 8], strides = [1, 1]} : vector<32x32xbf16> to vector<32x8xbf16>
    %37 = vector.extract_strided_slice %27 {offsets = [0, 24], sizes = [32, 8], strides = [1, 1]} : vector<32x32xbf16> to vector<32x8xbf16>
    %38 = tpu.concatenate %34, %35, %36, %37 in 0 : vector<32x8xbf16>, vector<32x8xbf16>, vector<32x8xbf16>, vector<32x8xbf16> -> vector<128x8xbf16>
    %39 = vector.extract_strided_slice %28 {offsets = [0, 0], sizes = [32, 8], strides = [1, 1]} : vector<32x32xbf16> to vector<32x8xbf16>
    %40 = vector.extract_strided_slice %28 {offsets = [0, 8], sizes = [32, 8], strides = [1, 1]} : vector<32x32xbf16> to vector<32x8xbf16>
    %41 = vector.extract_strided_slice %28 {offsets = [0, 16], sizes = [32, 8], strides = [1, 1]} : vector<32x32xbf16> to vector<32x8xbf16>
    %42 = vector.extract_strided_slice %28 {offsets = [0, 24], sizes = [32, 8], strides = [1, 1]} : vector<32x32xbf16> to vector<32x8xbf16>
    %43 = tpu.concatenate %39, %40, %41, %42 in 0 : vector<32x8xbf16>, vector<32x8xbf16>, vector<32x8xbf16>, vector<32x8xbf16> -> vector<128x8xbf16>
    %cst_19 = arith.constant dense<0.000000e+00> : vector<128x128xf32>
    %44 = tpu.matmul %33, %38, %cst_19 {dimension_numbers = #tpu.dot_dimension_numbers<[1], [1], [0], [0], [0, 0, 1, 0], [], []>} : vector<128x8xbf16>, vector<128x8xbf16>, vector<128x128xf32> -> vector<128x128xf32>
    %c0_20 = arith.constant 0 : index
    %c0_21 = arith.constant 0 : index
    %45 = vector.load %arg2[%c0_20, %c0_21] : memref<128x128xi8, #tpu.memory_space<vmem>>, vector<128x128xi8>
    %c0_i8 = arith.constant 0 : i8
    %46 = vector.broadcast %c0_i8 : i8 to vector<128x128xi8>
    %47 = arith.cmpi ne, %45, %46 : vector<128x128xi8>
    %cst_22 = arith.constant -1.000000e+30 : f32
    %48 = vector.broadcast %cst_22 : f32 to vector<128x128xf32>
    %49 = arith.select %47, %44, %48 : vector<128x128xi1>, vector<128x128xf32>
    %cst_23 = arith.constant dense<0xFF800000> : vector<128xf32>
    %50 = vector.multi_reduction <maximumf>, %49, %cst_23 [1] : vector<128x128xf32> to vector<128xf32>
    %51 = vector.shape_cast %50 : vector<128xf32> to vector<128x1xf32>
    %52 = vector.broadcast %51 : vector<128x1xf32> to vector<128x128xf32>
    %53 = arith.subf %49, %52 : vector<128x128xf32>
    %54 = math.exp %53 : vector<128x128xf32>
    %cst_24 = arith.constant dense<0.000000e+00> : vector<128xf32>
    %55 = vector.multi_reduction <add>, %54, %cst_24 [1] : vector<128x128xf32> to vector<128xf32>
    %56 = vector.shape_cast %55 : vector<128xf32> to vector<128x1xf32>
    %57 = tpu.reciprocal %56 {approx = true} : vector<128x1xf32> -> vector<128x1xf32>
    %58 = vector.broadcast %57 : vector<128x1xf32> to vector<128x128xf32>
    %59 = arith.mulf %54, %58 : vector<128x128xf32>
    %60 = arith.truncf %59 : vector<128x128xf32> to vector<128x128xbf16>
    %cst_25 = arith.constant dense<0.000000e+00> : vector<128x8xf32>
    %61 = tpu.matmul %60, %43, %cst_25 {dimension_numbers = #tpu.dot_dimension_numbers<[1], [0], [0], [1], [0, 0, 1, 1], [], []>} : vector<128x128xbf16>, vector<128x8xbf16>, vector<128x8xf32> -> vector<128x8xf32>
    %cst_26 = arith.constant 0.000000e+00 : f32
    %62 = vector.broadcast %cst_26 : f32 to vector<32x32xf32>
    %63 = vector.extract_strided_slice %61 {offsets = [0, 0], sizes = [32, 8], strides = [1, 1]} : vector<128x8xf32> to vector<32x8xf32>
    %64 = vector.extract_strided_slice %23 {offsets = [0, 0], sizes = [32, 8], strides = [1, 1]} : vector<32x32xf32> to vector<32x8xf32>
    %65 = arith.mulf %63, %64 : vector<32x8xf32>
    %66 = arith.truncf %65 : vector<32x8xf32> to vector<32x8xbf16>
    %c128 = arith.constant 128 : index
    %c0_27 = arith.constant 0 : index
    %67 = vector.load %arg3[%c128, %c0_27] : memref<160x32xbf16, #tpu.memory_space<vmem>>, vector<8x32xbf16>
    %cst_28 = arith.constant dense<0.000000e+00> : vector<32x32xf32>
    %68 = tpu.matmul %66, %67, %cst_28 {dimension_numbers = #tpu.dot_dimension_numbers<[1], [0], [0], [1], [0, 0, 1, 1], [], []>} : vector<32x8xbf16>, vector<8x32xbf16>, vector<32x32xf32> -> vector<32x32xf32>
    %69 = arith.addf %62, %68 : vector<32x32xf32>
    %70 = vector.extract_strided_slice %61 {offsets = [32, 0], sizes = [32, 8], strides = [1, 1]} : vector<128x8xf32> to vector<32x8xf32>
    %71 = vector.extract_strided_slice %23 {offsets = [0, 8], sizes = [32, 8], strides = [1, 1]} : vector<32x32xf32> to vector<32x8xf32>
    %72 = arith.mulf %70, %71 : vector<32x8xf32>
    %73 = arith.truncf %72 : vector<32x8xf32> to vector<32x8xbf16>
    %c136 = arith.constant 136 : index
    %c0_29 = arith.constant 0 : index
    %74 = vector.load %arg3[%c136, %c0_29] : memref<160x32xbf16, #tpu.memory_space<vmem>>, vector<8x32xbf16>
    %cst_30 = arith.constant dense<0.000000e+00> : vector<32x32xf32>
    %75 = tpu.matmul %73, %74, %cst_30 {dimension_numbers = #tpu.dot_dimension_numbers<[1], [0], [0], [1], [0, 0, 1, 1], [], []>} : vector<32x8xbf16>, vector<8x32xbf16>, vector<32x32xf32> -> vector<32x32xf32>
    %76 = arith.addf %69, %75 : vector<32x32xf32>
    %77 = vector.extract_strided_slice %61 {offsets = [64, 0], sizes = [32, 8], strides = [1, 1]} : vector<128x8xf32> to vector<32x8xf32>
    %78 = vector.extract_strided_slice %23 {offsets = [0, 16], sizes = [32, 8], strides = [1, 1]} : vector<32x32xf32> to vector<32x8xf32>
    %79 = arith.mulf %77, %78 : vector<32x8xf32>
    %80 = arith.truncf %79 : vector<32x8xf32> to vector<32x8xbf16>
    %c144 = arith.constant 144 : index
    %c0_31 = arith.constant 0 : index
    %81 = vector.load %arg3[%c144, %c0_31] : memref<160x32xbf16, #tpu.memory_space<vmem>>, vector<8x32xbf16>
    %cst_32 = arith.constant dense<0.000000e+00> : vector<32x32xf32>
    %82 = tpu.matmul %80, %81, %cst_32 {dimension_numbers = #tpu.dot_dimension_numbers<[1], [0], [0], [1], [0, 0, 1, 1], [], []>} : vector<32x8xbf16>, vector<8x32xbf16>, vector<32x32xf32> -> vector<32x32xf32>
    %83 = arith.addf %76, %82 : vector<32x32xf32>
    %84 = vector.extract_strided_slice %61 {offsets = [96, 0], sizes = [32, 8], strides = [1, 1]} : vector<128x8xf32> to vector<32x8xf32>
    %85 = vector.extract_strided_slice %23 {offsets = [0, 24], sizes = [32, 8], strides = [1, 1]} : vector<32x32xf32> to vector<32x8xf32>
    %86 = arith.mulf %84, %85 : vector<32x8xf32>
    %87 = arith.truncf %86 : vector<32x8xf32> to vector<32x8xbf16>
    %c152 = arith.constant 152 : index
    %c0_33 = arith.constant 0 : index
    %88 = vector.load %arg3[%c152, %c0_33] : memref<160x32xbf16, #tpu.memory_space<vmem>>, vector<8x32xbf16>
    %cst_34 = arith.constant dense<0.000000e+00> : vector<32x32xf32>
    %89 = tpu.matmul %87, %88, %cst_34 {dimension_numbers = #tpu.dot_dimension_numbers<[1], [0], [0], [1], [0, 0, 1, 1], [], []>} : vector<32x8xbf16>, vector<8x32xbf16>, vector<32x32xf32> -> vector<32x32xf32>
    %90 = arith.addf %83, %89 : vector<32x32xf32>
    %c4 = arith.constant 4 : index
    %c0_35 = arith.constant 0 : index
    %91 = vector.load %arg4[%c4, %c0_35] : memref<5x32xf32, #tpu.memory_space<vmem>>, vector<1x32xf32>
    %92 = vector.broadcast %91 : vector<1x32xf32> to vector<32x32xf32>
    %93 = arith.addf %90, %92 : vector<32x32xf32>
    %c0_36 = arith.constant 0 : index
    %c0_37 = arith.constant 0 : index
    %94 = vector.load %arg5[%c0_36, %c0_37] : memref<32x32xf32, #tpu.memory_space<vmem>>, vector<32x32xf32>
    tpu.vector_store %arg5[%c0_36, %c0_37], %93 {strides = array<i32>} : memref<32x32xf32, #tpu.memory_space<vmem>>, vector<32x32xf32>,
    return
  }
  func.func @transform_0(%arg0: i32) -> (i32, i32) {
    %c0_i32 = arith.constant 0 : i32
    %c0_i32_0 = arith.constant 0 : i32
    %c0_i32_1 = arith.constant 0 : i32
    return %c0_i32, %c0_i32_0 : i32, i32
  }
  func.func @transform_1(%arg0: i32) -> (i32, i32) {
    %c0_i32 = arith.constant 0 : i32
    %c0_i32_0 = arith.constant 0 : i32
    %c0_i32_1 = arith.constant 0 : i32
    return %c0_i32, %c0_i32_0 : i32, i32
  }
  func.func @transform_2(%arg0: i32) -> (i32, i32) {
    %c0_i32 = arith.constant 0 : i32
    %c0_i32_0 = arith.constant 0 : i32
    %c0_i32_1 = arith.constant 0 : i32
    return %c0_i32, %c0_i32_0 : i32, i32
  }
  func.func @transform_3(%arg0: i32) -> (i32, i32) {
    %c0_i32 = arith.constant 0 : i32
    %c0_i32_0 = arith.constant 0 : i32
    %c0_i32_1 = arith.constant 0 : i32
    return %c0_i32, %c0_i32_0 : i32, i32
  }
  func.func @transform_4(%arg0: i32) -> (i32, i32) {
    %c0_i32 = arith.constant 0 : i32
    %c0_i32_0 = arith.constant 0 : i32
    %c0_i32_1 = arith.constant 0 : i32
    return %c0_i32, %c0_i32_0 : i32, i32
  }
}

</mosaic_0001>

<bundles_post_ra>
// kernel: tpu_custom_call.1
= control target key start
LH: loop header
LB: loop body
LE: loop exit
PB: predicated region body
PF: predicated region fallthrough
CT: control target
= control target key end

     0   :  { %vm56_vm0 = vcmask 261120   ;;  %s2086_s0 = inlined_call_operand.vmem [shape: bf16[96,32], index: 0, kind: input, shape index: {}]   ;;  %s2087_s1 = inlined_call_operand.vmem [shape: s8[128,128], index: 1, kind: input, shape index: {}]   ;;  %s2088_s2 = inlined_call_operand.vmem [shape: bf16[160,32], index: 2, kind: input, shape index: {}]   ;;  %s2089_s3 = inlined_call_operand.vmem [shape: f32[5,32], index: 3, kind: input, shape index: {}]   ;;  %s2090_s4 = inlined_call_operand.hbm [shape: f32[32,32], index: 4, kind: output, shape index: {}]  }
   0x1   :  { %v1555_v0 = vld [vmem:[%s2088_s2 + $0x10] sm:$0xff]   ;;  %v1556_v1 = vld [vmem:[%s2088_s2 + $0x18] sm:$0xff]   ;;  %v1559_v4 = vld [vmem:[%s2088_s2] sm:$0xff]  }
   0x2   :  { %1412 = vmatprep.subr.bf16.mxu1 %v1555_v0  ;;  %v1557_v2 = vld [vmem:[%s2086_s0 + $0x10] sm:$0xff]   ;;  %v1558_v3 = vld [vmem:[%s2086_s0 + $0x18] sm:$0xff]   ;;  %v1560_v5 = vld [vmem:[%s2088_s2 + $0x8] sm:$0xff]   ;;  %1404 = vmatprep.subr.bf16.mxu0 %v1559_v4 }
   0x3   :  { %1413 = vmatpush3.bf16.msra.mxu1 %v1555_v0  ;;  %1416 = vmatprep.mubr.msk.bf16.mxu1 %vm56_vm0, %v1557_v2  ;;  %v1561_v6 = vld [vmem:[%s2086_s0] sm:$0xff]   ;;  %v1562_v8 = vld [vmem:[%s2086_s0 + $0x8] sm:$0xff]  }
   0x4   :  { %1414 = vmatprep.subr.bf16.mxu1 %v1556_v1  ;;  %1405 = vmatpush3.bf16.msra.mxu0 %v1559_v4  ;;  %v1563_v7 = vld [vmem:[%s2088_s2 + $0x20] sm:$0xff]   ;;  %v1564_v9 = vld [vmem:[%s2088_s2 + $0x28] sm:$0xff]  }
   0x5   :  { %1406 = vmatprep.subr.bf16.mxu0 %v1560_v5  ;;  %1408 = vmatprep.mubr.msk.bf16.mxu0 %vm56_vm0, %v1561_v6 }
   0x7   :  { %1415 = vmatpush3.bf16.msra.mxu1 %v1556_v1 }
   0x8   :  { %1407 = vmatpush3.bf16.msra.mxu0 %v1560_v5 }
   0x9   :  { %1420 = vmatprep.subr.bf16.mxu0 %v1563_v7 }
   0xa   :  { %1417 = vmatmul.mubr.msk.bf16.vlgmr.msra.gmra.mrb[0].mxu1 %vm56_vm0, %v1558_v3 }
   0xb   :  { %9 = vsyncpa [#allocation3], 0  ;;  %1409 = vmatmul.mubr.msk.bf16.vlgmr.msra.gmra.mrb[0].mxu0 %vm56_vm0, %v1562_v8  ;;  %v1565_v10 = vld [vmem:[%s2086_s0 + $0x20] sm:$0xff]   ;;  %v1566_v11 = vld [vmem:[%s2086_s0 + $0x28] sm:$0xff]   ;;  %vm428_vm1 = vcmask 64512   ;;  %s1657_s20 = smov 112  }
   0xc   :  { %1421 = vmatpush3.bf16.msra.mxu0 %v1563_v7  ;;  %1424 = vmatprep.mubr.msk.bf16.mxu0 %vm56_vm0, %v1565_v10  ;;  %v1567_v12 = vld [vmem:[%s2088_s2 + $0x30] sm:$0xff]   ;;  %v1568_v13 = vld [vmem:[%s2088_s2 + $0x38] sm:$0xff]   ;;  %v1308_v15 = vld [vmem:[%s2089_s3 + $0x1] ss:$0 sm:$0xff]  ;;  %s1658_s21 = smov 120   ;;  %s1659_s22 = smov 104  }
   0xd   :  { %1422 = vmatprep.subr.bf16.mxu0 %v1564_v9  ;;  %1428 = vmatprep.subr.bf16.mxu1 %v1567_v12  ;;  %v1301_v18 = vld [vmem:[%s2089_s3] ss:$0 sm:$0xff]  ;;  %v1315_v45 = vld [vmem:[%s2089_s3 + $0x2] ss:$0 sm:$0xff]  ;;  %s1661_s17 = smov [#allocation2]  }
   0xe   :  { %1429 = vmatpush3.bf16.msra.mxu1 %v1567_v12  ;;  %s1290_s18 = sshll.u32 %s1661_s17, 4  ;;  %s1291_s18 = int_to_ptr.vmem [resolvable:$true] %s1290_s18 }
   0xf   :  { %1430 = vmatprep.subr.bf16.mxu1 %v1568_v13  ;;  %p1638_p1 = scmp.lt.s32.totalorder %s1291_s18, %s1291_s18 }
  0x10   :  { %1423 = vmatpush3.bf16.msra.mxu0 %v1564_v9 }
  0x12   :  { %1431 = vmatpush3.bf16.msra.mxu1 %v1568_v13  ;;  %v574_v13 = vld [vmem:[%s2087_s1] sm:$0xff] }
  0x13   :  { %1425 = vmatmul.mubr.msk.bf16.vlgmr.msra.gmra.mrb[4].mxu0 %vm56_vm0, %v1566_v11  ;;  %vm578_vm2 = vnez %v574_v13 }
  0xdd   :  { %v1418_v14 = vpop.f32.mrb[0].mxu1 }
  0xde   :  { %v187_v16 = vpop.f32.mrb[1].mxu1  ;;  %v196_v19 = vadd.f32 %v1418_v14, %v1308_v15  ;;  %v1410_v24 = vpop.f32.mrb[0].mxu0  ;;  %v1660_v14 = vmov 0  }
  0xdf   :  { %v1419_v17 = vpop.f32.mrb[2].mxu1  ;;  %v188_v22 = vadd.f32 %v1308_v15, %v187_v16  ;;  %v106_v26 = vadd.f32 %v1410_v24, %v1301_v18  ;;  %v97_v27 = vpop.f32.mrb[1].mxu0  ;;  %v575_v16 = vld [vmem:[%s2087_s1 + $0x8] sm:$0xff] }
  0xe0   :  { %v199_v20 = vadd.f32 %v1419_v17, %v1308_v15  ;;  %v190_v21 = vpop.f32.mrb[3].mxu1  ;;  %v98_v29 = vadd.f32 %v1301_v18, %v97_v27  ;;  %v1411_v30 = vpop.f32.mrb[2].mxu0  ;;  %vm579_vm3 = vnez %v575_v16  ;;  %v576_v27 = vld [vmem:[%s2087_s1 + $0x10] sm:$0xff] }
  0xe1   :  { %v191_v23 = vadd.f32 %v1308_v15, %v190_v21  ;;  %v372_v31 = vmul.f32 0.35355338, %v106_v26  ;;  %v109_v32 = vadd.f32 %v1411_v30, %v1301_v18  ;;  %v100_v33 = vpop.f32.mrb[3].mxu0  ;;  %v582_v15 = vsel %vm578_vm2, 16843009, %v1660_v14 }
  0xe2   :  { %v377_v25 = vpack.c.bf16 %v199_v20, %v196_v19  ;;  %v370_v35 = vmul.f32 0.35355338, %v98_v29  ;;  %v101_v36 = vadd.f32 %v1301_v18, %v100_v33  ;;  %v588_v17 = vunpack.c.2.s8 %v582_v15 }
  0xe3   :  { %v376_v28 = vpack.c.bf16 %v191_v23, %v188_v22  ;;  %v293_v37 = vpack.c.bf16 %v109_v32, %v106_v26  ;;  %v373_v38 = vmul.f32 0.35355338, %v109_v32  ;;  %v586_v18 = vunpack.c.0.s8 %v582_v15 }
  0xe4   :  { %v292_v39 = vpack.c.bf16 %v101_v36, %v98_v29  ;;  %v371_v40 = vmul.f32 0.35355338, %v101_v36  ;;  %v457_v43 = vsel %vm428_vm1, %v377_v25, 0  ;;  %v606_v19 = vpack.c.b16 %v588_v17, %v588_v17 }
  0xe5   :  { %400 = vrot.lane.b32.xlu1 %v376_v28, %s1657_s20  ;;  %396 = vrot.lane.b32.xlu0 %v376_v28, %s1658_s21  ;;  %v454_v34 = vsel %vm428_vm1, %v376_v28, 0  ;;  %v375_v41 = vpack.c.bf16 %v373_v38, %v372_v31  ;;  %v587_v20 = vunpack.c.1.s8 %v582_v15  ;;  %v583_v21 = vsel %vm579_vm3, 16843009, %v1660_v14 }
  0xe6   :  { %1536 = vmatprep.subr.msk.bf16.mxu0 %vm428_vm1, %v376_v28  ;;  %v374_v42 = vpack.c.bf16 %v371_v40, %v370_v35  ;;  %1432 = vmatprep.mubr.msk.bf16.mxu1 %vm56_vm0, %v292_v39  ;;  %v1426_v44 = vpop.f32.mrb[4].mxu0  ;;  %v602_v22 = vpack.c.b16 %v586_v18, %v586_v18  ;;  %v589_v23 = vunpack.c.3.s8 %v582_v15  ;;  %v607_v24 = vpack.c.b8 %v606_v19, %v606_v19 }
  0xe7   :  { %1437 = vmatpush3.bf16.xpose.msra.mxu0 %v454_v34  ;;  %1433 = vmatmul.mubr.msk.bf16.vlgmr.msra.gmra.mrb[4].mxu1 %vm56_vm0, %v293_v37  ;;  %v286_v46 = vadd.f32 %v1426_v44, %v1315_v45  ;;  %v277_v47 = vpop.f32.mrb[5].mxu0  ;;  %v592_v26 = vunpack.c.2.s8 %v583_v21  ;;  %vm580_vm4 = vnez %v576_v27  ;;  %v591_v33 = vunpack.c.1.s8 %v583_v21 }
  0xe8   :  { %1537 = vmatprep.subr.msk.bf16.mxu0 %vm428_vm1, %v377_v25  ;;  %1452 = vmatprep.mubr.msk.bf16.mxu0 %vm428_vm1, %v374_v42  ;;  %v278_v48 = vadd.f32 %v1315_v45, %v277_v47  ;;  %v1427_v49 = vpop.f32.mrb[6].mxu0  ;;  %v603_v29 = vpack.c.b8 %v602_v22, %v602_v22  ;;  %v608_v30 = vpack.c.b16 %v589_v23, %v589_v23  ;;  %v584_v35 = vsel %vm580_vm4, 16843009, %v1660_v14 }
  0xe9   :  { %402 = vrot.lane.b32.xlu1 %v377_v25, %s1657_s20  ;;  %398 = vrot.lane.b32.xlu0 %v377_v25, %s1658_s21  ;;  %v289_v50 = vadd.f32 %v1427_v49, %v1315_v45  ;;  %v280_v51 = vpop.f32.mrb[7].mxu0  ;;  %vm636_vm5 = vnez %v607_v24  ;;  %v614_v32 = vpack.c.b16 %v592_v26, %v592_v26  ;;  %v612_v39 = vpack.c.b16 %v591_v33, %v591_v33 }
  0xea   :  { %v281_v52 = vadd.f32 %v1315_v45, %v280_v51  ;;  %v652_v36 = vsel %vm636_vm5, 16843009, %v1660_v14  ;;  %vm634_vm6 = vnez %v603_v29  ;;  %v609_v37 = vpack.c.b8 %v608_v30, %v608_v30 }
  0xeb   :  { %v1765_v53 = vpack.c.bf16 %v289_v50, %v286_v46  ;;  %v615_v38 = vpack.c.b8 %v614_v32, %v614_v32  ;;  %v593_v40 = vunpack.c.3.s8 %v583_v21  ;;  %v594_v45 = vunpack.c.0.s8 %v584_v35 }
  0xec   :  { %v1767_v54 = vpack.c.bf16 %v281_v52, %v278_v48  ;;  %v650_v47 = vsel %vm634_vm6, 16843009, %v1660_v14  ;;  %vm637_vm8 = vnez %v609_v37  ;;  %v613_v48 = vpack.c.b8 %v612_v39, %v612_v39 }
  0xed   :  { %406 = vrot.lane.b32.xlu1 %v377_v25, %s1659_s22  ;;  %404 = vrot.lane.b32.xlu0 %v376_v28, %s1659_s22  ;;  %v604_v25 = vpack.c.b16 %v587_v20, %v587_v20  ;;  %v590_v28 = vunpack.c.0.s8 %v583_v21  ;;  %vm640_vm10 = vnez %v615_v38  ;;  %v616_v49 = vpack.c.b16 %v593_v40, %v593_v40 }
  0xee   :  { %1468 = vmatprep.subr.bf16.mxu1 %v1767_v54  ;;  %v597_v50 = vunpack.c.3.s8 %v584_v35  ;;  %vm1823_vm13 = vnez %v613_v48 }
  0xef   :  { %1439 = vmatpush3.bf16.xpose.msra.mxu0 %v457_v43  ;;  %1469 = vmatpush3.bf16.msra.mxu1 %v1767_v54  ;;  %v605_v31 = vpack.c.b8 %v604_v25, %v604_v25  ;;  %v610_v34 = vpack.c.b16 %v590_v28, %v590_v28  ;;  %v668_v43 = vunpack.c.0.s8 %v652_v36  ;;  %v655_v16 = vsel %vm1823_vm13, 16843009, %v1660_v14 }
  0xf0   :  { %1470 = vmatprep.subr.bf16.mxu1 %v1765_v53  ;;  %v671_v25 = vunpack.c.0.s8 %v655_v16 }
  0xf1   :  { %384 = vrot.lane.b32.xlu1 %v375_v41, %s1658_s21  ;;  %382 = vrot.lane.b32.xlu0 %v374_v42, %s1658_s21  ;;  %vm635_vm7 = vnez %v605_v31  ;;  %v611_v44 = vpack.c.b8 %v610_v34, %v610_v34  ;;  %vm684_vm12 = vcmp.ne.s32.totalorder %v668_v43, 0 }
  0xf2   :  { %v651_v46 = vsel %vm635_vm7, 16843009, %v1660_v14 }
  0xf3   :  { %1471 = vmatpush3.bf16.msra.mxu1 %v1765_v53  ;;  %v667_v52 = vunpack.c.0.s8 %v651_v46  ;;  %vm638_vm11 = vnez %v611_v44 }
  0xf5   :  { %388 = vrot.lane.b32.xlu1 %v375_v41, %s1657_s20  ;;  %386 = vrot.lane.b32.xlu0 %v374_v42, %s1657_s20  ;;  %vm683_vm14 = vcmp.ne.s32.totalorder %v667_v52, 0 }
  0xf9   :  { %392 = vrot.lane.b32.xlu1 %v375_v41, %s1659_s22  ;;  %390 = vrot.lane.b32.xlu0 %v374_v42, %s1659_s22  ;;  %v596_v42 = vunpack.c.2.s8 %v584_v35 }
  0xfb   :  { %v622_v51 = vpack.c.b16 %v596_v42, %v596_v42 }
 0x157   :  { %v397_v55 = vpop.permute.xlu0 %396  ;;  %v401_v59 = vpop.permute.xlu1 %400 }
 0x158   :  { %v460_v56 = vsel %vm428_vm1, %v397_v55, 0  ;;  %1538 = vmatprep.subr.msk.bf16.mxu0 %vm428_vm1, %v397_v55  ;;  %v466_v60 = vsel %vm428_vm1, %v401_v59, 0 }
 0x159   :  { %1441 = vmatpush3.bf16.xpose.msra.mxu0 %v460_v56  ;;  %v618_v56 = vpack.c.b16 %v594_v45, %v594_v45 }
 0x15b   :  { %v399_v57 = vpop.permute.xlu0 %398  ;;  %v403_v61 = vpop.permute.xlu1 %402 }
 0x15c   :  { %1539 = vmatprep.subr.msk.bf16.mxu0 %vm428_vm1, %v399_v57  ;;  %v463_v58 = vsel %vm428_vm1, %v399_v57, 0  ;;  %v469_v62 = vsel %vm428_vm1, %v403_v61, 0  ;;  %v666_v57 = vunpack.c.0.s8 %v650_v47 }
 0x15e   :  { %vm682_vm15 = vcmp.ne.s32.totalorder %v666_v57, 0 }
 0x15f   :  { %v405_v63 = vpop.permute.xlu0 %404  ;;  %v407_v1 = vpop.permute.xlu1 %406 }
 0x160   :  { %v472_v0 = vsel %vm428_vm1, %v405_v63, 0  ;;  %v475_v2 = vsel %vm428_vm1, %v407_v1, 0 }
 0x161   :  { %1443 = vmatpush3.bf16.xpose.msra.mxu0 %v463_v58  ;;  %v653_v58 = vsel %vm637_vm8, 16843009, %v1660_v14 }
 0x162   :  { %1540 = vmatprep.subr.msk.bf16.mxu0 %vm428_vm1, %v401_v59  ;;  %v656_v59 = vsel %vm640_vm10, 16843009, %v1660_v14  ;;  %v669_v13 = vunpack.c.0.s8 %v653_v58 }
 0x163   :  { %v383_v3 = vpop.permute.xlu0 %382  ;;  %v385_v4 = vpop.permute.xlu1 %384  ;;  %v672_v15 = vunpack.c.0.s8 %v656_v59 }
 0x164   :  { %vm685_vm5 = vcmp.ne.s32.totalorder %v669_v13, 0 }
 0x165   :  { %vm688_vm6 = vcmp.ne.s32.totalorder %v672_v15, 0 }
 0x167   :  { %v387_v5 = vpop.permute.xlu0 %386  ;;  %v389_v6 = vpop.permute.xlu1 %388 }
 0x169   :  { %1445 = vmatpush3.bf16.xpose.msra.mxu0 %v466_v60 }
 0x16a   :  { %1541 = vmatprep.subr.msk.bf16.mxu0 %vm428_vm1, %v403_v61  ;;  %v617_v61 = vpack.c.b8 %v616_v49, %v616_v49 }
 0x16b   :  { %v391_v7 = vpop.permute.xlu0 %390  ;;  %v393_v8 = vpop.permute.xlu1 %392 }
 0x16c   :  { %vm641_vm2 = vnez %v617_v61 }
 0x16d   :  { %v657_v27 = vsel %vm641_vm2, 16843009, %v1660_v14 }
 0x16e   :  { %v673_v42 = vunpack.c.0.s8 %v657_v27 }
 0x170   :  { %vm689_vm13 = vcmp.ne.s32.totalorder %v673_v42, 0 }
 0x171   :  { %1447 = vmatpush3.bf16.xpose.msra.mxu0 %v469_v62  ;;  %v624_v62 = vpack.c.b16 %v597_v50, %v597_v50 }
 0x172   :  { %1542 = vmatprep.subr.msk.bf16.mxu0 %vm428_vm1, %v405_v63  ;;  %v595_v63 = vunpack.c.1.s8 %v584_v35 }
 0x173   :  { %v625_v19 = vpack.c.b8 %v624_v62, %v624_v62 }
 0x174   :  { %v620_v20 = vpack.c.b16 %v595_v63, %v595_v63 }
 0x175   :  { %vm1848_vm8 = vnez %v625_v19 }
 0x176   :  { %v621_v30 = vpack.c.b8 %v620_v20, %v620_v20  ;;  %v661_v46 = vsel %vm1848_vm8, 16843009, %v1660_v14 }
 0x178   :  { %vm643_vm10 = vnez %v621_v30 }
 0x179   :  { %1449 = vmatpush3.bf16.xpose.msra.mxu0 %v472_v0  ;;  %v659_v52 = vsel %vm643_vm10, 16843009, %v1660_v14  ;;  %vm999_vm10 = vcmask 1043456  }
 0x17a   :  { %1543 = vmatprep.subr.msk.bf16.mxu0 %vm428_vm1, %v407_v1  ;;  %v654_v1 = vsel %vm638_vm11, 16843009, %v1660_v14  ;;  %v675_v63 = vunpack.c.0.s8 %v659_v52 }
 0x17b   :  { %v670_v18 = vunpack.c.0.s8 %v654_v1 }
 0x17d   :  { %vm1844_vm7 = vcmp.ne.s32.totalorder %v670_v18, 0 }
 0x181   :  { %1451 = vmatpush3.bf16.xpose.msra.mxu0 %v475_v2  ;;  %v623_v2 = vpack.c.b8 %v622_v51, %v622_v51  ;;  %v677_v51 = vunpack.c.0.s8 %v661_v46 }
 0x183   :  { %vm644_vm3 = vnez %v623_v2 }
 0x184   :  { %v660_v31 = vsel %vm644_vm3, 16843009, %v1660_v14  ;;  %vm693_vm3 = vcmp.ne.s32.totalorder %v677_v51, 0 }
 0x185   :  { %v676_v43 = vunpack.c.0.s8 %v660_v31 }
 0x188   :  { %1453 = vmatmul.mubr.msk.bf16.vlgmr.msra.gmra.mrb[8].mxu0 %vm428_vm1, %v375_v41  ;;  %v577_v41 = vld [vmem:[%s2087_s1 + $0x18] sm:$0xff] }
 0x189   :  { %1456 = vmatprep.mubr.msk.bf16.mxu0 %vm428_vm1, %v383_v3  ;;  %vm581_vm9 = vnez %v577_v41 }
 0x18a   :  { %v1819_v55 = vsel %vm581_vm9, 16843009, %v1660_v14  ;;  %vm687_vm9 = vcmp.ne.s32.totalorder %v671_v25, 0 }
 0x18b   :  { %v600_v3 = vunpack.c.2.s8 %v1819_v55  ;;  %v601_v22 = vunpack.c.3.s8 %v1819_v55  ;;  %v599_v34 = vunpack.c.1.s8 %v1819_v55 }
 0x18d   :  { %v630_v23 = vpack.c.b16 %v600_v3, %v600_v3  ;;  %v632_v33 = vpack.c.b16 %v601_v22, %v601_v22  ;;  %v628_v50 = vpack.c.b16 %v599_v34, %v599_v34 }
 0x18f   :  { %v631_v36 = vpack.c.b8 %v630_v23, %v630_v23  ;;  %v633_v49 = vpack.c.b8 %v632_v33, %v632_v33  ;;  %v629_v57 = vpack.c.b8 %v628_v50, %v628_v50 }
 0x190   :  { %1457 = vmatmul.mubr.msk.bf16.gmra.mrb[12].mxu0 %vm428_vm1, %v385_v4 }
 0x191   :  { %1460 = vmatprep.mubr.msk.bf16.mxu0 %vm428_vm1, %v387_v5  ;;  %vm648_vm11 = vnez %v631_v36  ;;  %vm649_vm2 = vnez %v633_v49 }
 0x192   :  { %v665_v3 = vsel %vm649_vm2, 16843009, %v1660_v14 }
 0x198   :  { %1461 = vmatmul.mubr.msk.bf16.gmra.mrb[16].mxu0 %vm428_vm1, %v389_v6  ;;  %v619_v6 = vpack.c.b8 %v618_v56, %v618_v56 }
 0x199   :  { %1464 = vmatprep.mubr.msk.bf16.mxu0 %vm428_vm1, %v391_v7  ;;  %v598_v7 = vunpack.c.0.s8 %v1819_v55  ;;  %v664_v55 = vsel %vm648_vm11, 16843009, %v1660_v14 }
 0x19a   :  { %vm642_vm4 = vnez %v619_v6  ;;  %v680_v1 = vunpack.c.0.s8 %v664_v55 }
 0x19b   :  { %v626_v26 = vpack.c.b16 %v598_v7, %v598_v7  ;;  %v658_v35 = vsel %vm642_vm4, 16843009, %v1660_v14  ;;  %vm647_vm4 = vnez %v629_v57  ;;  %v681_v7 = vunpack.c.0.s8 %v665_v3 }
 0x19c   :  { %v674_v47 = vunpack.c.0.s8 %v658_v35 }
 0x19d   :  { %v627_v40 = vpack.c.b8 %v626_v26, %v626_v26  ;;  %vm697_vm8 = vcmp.ne.s32.totalorder %v681_v7, 0 }
 0x1a0   :  { %1465 = vmatmul.mubr.msk.bf16.gmra.mrb[20].mxu0 %vm428_vm1, %v393_v8 }
 0x1ba   :  { %v1792_v9 = vpop.f32.mrb[4].mxu1 }
 0x1bb   :  { %v1794_v10 = vpop.f32.mrb[5].mxu1 }
 0x1bc   :  { %v1796_v11 = vpop.f32.mrb[6].mxu1 }
 0x1bd   :  { %v1798_v12 = vpop.f32.mrb[7].mxu1 }
 0x25b   :  { %v1454_v0 = vpop.f32.mrb[8].mxu0 }
 0x25c   :  { %v511_v4 = vpop.f32.mrb[9].mxu0  ;;  %v1829_v5 = vsel %vm684_vm12, %v1454_v0, -1e+30  ;;  %vm646_vm12 = vnez %v627_v40 }
 0x25d   :  { %718 = vmax.xlane.f32.xlu0 %v1829_v5  ;;  %v1455_v8 = vpop.f32.mrb[10].mxu0  ;;  %v1840_v24 = vsel %vm682_vm15, %v511_v4, -1e+30  ;;  %vm690_vm15 = vcmp.ne.s32.totalorder %v674_v47, 0  ;;  %v662_v58 = vsel %vm646_vm12, 16843009, %v1660_v14 }
 0x25e   :  { %v514_v17 = vpop.f32.mrb[11].mxu0  ;;  %v1855_v37 = vsel %vm685_vm5, %v1455_v8, -1e+30  ;;  %v678_v4 = vunpack.c.0.s8 %v662_v58  ;;  %vm691_vm5 = vcmp.ne.s32.totalorder %v675_v63, 0  ;;  %v663_v8 = vsel %vm647_vm4, 16843009, %v1660_v14 }
 0x25f   :  { %v1836_v21 = vsel %vm683_vm14, %v514_v17, -1e+30  ;;  %vm692_vm14 = vcmp.ne.s32.totalorder %v676_v43, 0  ;;  %v679_v19 = vunpack.c.0.s8 %v663_v8 }
 0x260   :  { %716 = vmax.xlane.f32.xlu1 %v1836_v21 }
 0x261   :  { %714 = vmax.xlane.f32.xlu0 %v1840_v24 }
 0x263   :  { %v1458_v32 = vpop.f32.mrb[12].mxu0 }
 0x264   :  { %v1857_v38 = vsel %vm688_vm6, %v1458_v32, -1e+30  ;;  %v527_v39 = vpop.f32.mrb[13].mxu0  ;;  %vm696_vm6 = vcmp.ne.s32.totalorder %v680_v1, 0 }
 0x265   :  { %720 = vmax.xlane.f32.xlu0 %v1855_v37  ;;  %726 = vmax.xlane.f32.xlu1 %v1857_v38  ;;  %v1459_v41 = vpop.f32.mrb[14].mxu0  ;;  %v1863_v45 = vsel %vm1844_vm7, %v527_v39, -1e+30  ;;  %vm694_vm7 = vcmp.ne.s32.totalorder %v678_v4, 0 }
 0x266   :  { %v530_v44 = vpop.f32.mrb[15].mxu0  ;;  %v1875_v60 = vsel %vm689_vm13, %v1459_v41, -1e+30 }
 0x267   :  { %v1868_v48 = vsel %vm687_vm9, %v530_v44, -1e+30  ;;  %vm695_vm9 = vcmp.ne.s32.totalorder %v679_v19, 0 }
 0x269   :  { %722 = vmax.xlane.f32.xlu1 %v1863_v45  ;;  %724 = vmax.xlane.f32.xlu0 %v1868_v48 }
 0x26b   :  { %v1462_v56 = vpop.f32.mrb[16].mxu0 }
 0x26c   :  { %v543_v59 = vpop.f32.mrb[17].mxu0  ;;  %v1877_v61 = vsel %vm692_vm14, %v1462_v56, -1e+30 }
 0x26d   :  { %728 = vmax.xlane.f32.xlu0 %v1875_v60  ;;  %v1463_v62 = vpop.f32.mrb[18].mxu0  ;;  %v1880_v0 = vsel %vm690_vm15, %v543_v59, -1e+30 }
 0x26e   :  { %v546_v2 = vpop.f32.mrb[19].mxu0  ;;  %v1883_v6 = vsel %vm693_vm3, %v1463_v62, -1e+30 }
 0x26f   :  { %v1887_v16 = vsel %vm691_vm5, %v546_v2, -1e+30 }
 0x271   :  { %736 = vmax.xlane.f32.xlu0 %v1883_v6 }
 0x273   :  { %v1466_v13 = vpop.f32.mrb[20].mxu0 }
 0x274   :  { %v559_v15 = vpop.f32.mrb[21].mxu0  ;;  %v1889_v17 = vsel %vm696_vm6, %v1466_v13, -1e+30 }
 0x275   :  { %732 = vmax.xlane.f32.xlu0 %v1887_v16  ;;  %v1467_v18 = vpop.f32.mrb[22].mxu0  ;;  %v1892_v20 = vsel %vm694_vm7, %v559_v15, -1e+30 }
 0x276   :  { %v562_v22 = vpop.f32.mrb[23].mxu0  ;;  %v1894_v23 = vsel %vm697_vm8, %v1467_v18, -1e+30 }
 0x277   :  { %v1899_v14 = vsel %vm695_vm9, %v562_v22, -1e+30 }
 0x279   :  { %744 = vmax.xlane.f32.xlu0 %v1894_v23 }
 0x27a   :  { %410 = vrot.lane.b32.xlu1 %v1767_v54, %s1658_s21 }
 0x27d   :  { %740 = vmax.xlane.f32.xlu0 %v1899_v14 }
 0x29e   :  { %734 = vmax.xlane.f32.xlu1 %v1877_v61 }
 0x2a2   :  { %730 = vmax.xlane.f32.xlu1 %v1880_v0 }
 0x2a6   :  { %742 = vmax.xlane.f32.xlu1 %v1889_v17 }
 0x2aa   :  { %738 = vmax.xlane.f32.xlu1 %v1892_v20 }
 0x2bb   :  { %412 = vrot.lane.b32.xlu1 %v1765_v53, %s1658_s21 }
 0x2ea   :  { %v719_v25 = vpop.xlane.xlu0 %718 }
 0x2eb   :  { %v748_v26 = vsub.f32 %v1829_v5, %v719_v25 }
 0x2ed   :  { %v766_v27 = vmul.f32 1.442695, %v748_v26  ;;  %v717_v28 = vpop.xlane.xlu1 %716 }
 0x2ee   :  { %v715_v29 = vpop.xlane.xlu0 %714  ;;  %v747_v34 = vsub.f32 %v1836_v21, %v717_v28 }
 0x2ef   :  { %1569 = vpow2.f32 %v766_v27  ;;  %v746_v30 = vsub.f32 %v1840_v24, %v715_v29 }
 0x2f0   :  { %v764_v41 = vmul.f32 1.442695, %v747_v34 }
 0x2f1   :  { %v762_v31 = vmul.f32 1.442695, %v746_v30 }
 0x2f2   :  { %v721_v32 = vpop.xlane.xlu0 %720  ;;  %v727_v33 = vpop.xlane.xlu1 %726 }
 0x2f3   :  { %1571 = vpow2.f32 %v762_v31  ;;  %v749_v35 = vsub.f32 %v1855_v37, %v721_v32  ;;  %v752_v5 = vsub.f32 %v1857_v38, %v727_v33  ;;  %v1322_v31 = vld [vmem:[%s2089_s3 + $0x3] ss:$0 sm:$0xff] }
 0x2f4   :  { %v1984_v32 = vadd.f32 %v1322_v31, %v1794_v10  ;;  %v1989_v33 = vadd.f32 %v1792_v9, %v1322_v31  ;;  %v1994_v34 = vadd.f32 %v1796_v11, %v1322_v31 }
 0x2f5   :  { %v768_v36 = vmul.f32 1.442695, %v749_v35  ;;  %v774_v24 = vmul.f32 1.442695, %v752_v5  ;;  %v1999_v35 = vadd.f32 %v1322_v31, %v1798_v12 }
 0x2f6   :  { %v723_v39 = vpop.xlane.xlu1 %722  ;;  %v725_v40 = vpop.xlane.xlu0 %724 }
 0x2f7   :  { %1573 = vpow2.f32 %v768_v36  ;;  %v750_v44 = vsub.f32 %v1863_v45, %v723_v39  ;;  %v751_v49 = vsub.f32 %v1868_v48, %v725_v40 }
 0x2f8   :  { %1575 = vpow2.f32 %v764_v41 }
 0x2f9   :  { %v1913_v42 = vpop.eup %1569  ;;  %1577 = vpow2.f32 %v774_v24  ;;  %v770_v46 = vmul.f32 1.442695, %v750_v44  ;;  %v772_v51 = vmul.f32 1.442695, %v751_v49 }
 0x2fa   :  { %v411_v43 = vpop.permute.xlu1 %410  ;;  %798 = vadd.xlane.f32.xlu1 %v1913_v42  ;;  %v729_v21 = vpop.xlane.xlu0 %728 }
 0x2fb   :  { %1472 = vmatprep.subr.bf16.mxu1 %v411_v43  ;;  %v753_v38 = vsub.f32 %v1875_v60, %v729_v21  ;;  %1579 = vpow2.f32 %v770_v46 }
 0x2fc   :  { %1473 = vmatpush3.bf16.msra.mxu1 %v411_v43 }
 0x2fd   :  { %v1917_v37 = vpop.eup %1571  ;;  %v776_v50 = vmul.f32 1.442695, %v753_v38 }
 0x2fe   :  { %794 = vadd.xlane.f32.xlu1 %v1917_v37  ;;  %v737_v57 = vpop.xlane.xlu0 %736 }
 0x2ff   :  { %1581 = vpow2.f32 %v776_v50 }
 0x300   :  { %1583 = vpow2.f32 %v772_v51 }
 0x301   :  { %v1921_v47 = vpop.eup %1573 }
 0x302   :  { %800 = vadd.xlane.f32.xlu0 %v1921_v47  ;;  %v1925_v45 = vpop.eup %1575  ;;  %v733_v63 = vpop.xlane.xlu0 %732 }
 0x303   :  { %v1928_v52 = vpop.eup %1577  ;;  %v755_v4 = vsub.f32 %v1887_v16, %v733_v63 }
 0x305   :  { %v1931_v55 = vpop.eup %1579  ;;  %v780_v15 = vmul.f32 1.442695, %v755_v4 }
 0x306   :  { %796 = vadd.xlane.f32.xlu0 %v1925_v45  ;;  %v745_v7 = vpop.xlane.xlu0 %744 }
 0x309   :  { %v1936_v48 = vpop.eup %1581 }
 0x30a   :  { %806 = vadd.xlane.f32.xlu0 %v1928_v52  ;;  %v1941_v56 = vpop.eup %1583  ;;  %v741_v19 = vpop.xlane.xlu0 %740 }
 0x30e   :  { %802 = vadd.xlane.f32.xlu0 %v1931_v55 }
 0x30f   :  { %418 = vrot.lane.b32.xlu1 %v1765_v53, %s1657_s20 }
 0x312   :  { %808 = vadd.xlane.f32.xlu0 %v1936_v48 }
 0x313   :  { %422 = vrot.lane.b32.xlu1 %v1767_v54, %s1659_s22 }
 0x316   :  { %804 = vadd.xlane.f32.xlu0 %v1941_v56 }
 0x317   :  { %424 = vrot.lane.b32.xlu1 %v1765_v53, %s1659_s22 }
 0x32b   :  { %v735_v58 = vpop.xlane.xlu1 %734 }
 0x32c   :  { %416 = vrot.lane.b32.xlu0 %v1767_v54, %s1657_s20  ;;  %v756_v60 = vsub.f32 %v1877_v61, %v735_v58  ;;  %v757_v61 = vsub.f32 %v1883_v6, %v737_v57  ;;  %v761_v6 = vsub.f32 %v1894_v23, %v745_v7 }
 0x32e   :  { %v782_v3 = vmul.f32 1.442695, %v756_v60  ;;  %v784_v16 = vmul.f32 1.442695, %v757_v61  ;;  %v792_v27 = vmul.f32 1.442695, %v761_v6 }
 0x32f   :  { %v731_v59 = vpop.xlane.xlu1 %730 }
 0x330   :  { %v754_v62 = vsub.f32 %v1880_v0, %v731_v59 }
 0x332   :  { %v778_v1 = vmul.f32 1.442695, %v754_v62 }
 0x333   :  { %v743_v2 = vpop.xlane.xlu1 %742 }
 0x334   :  { %1585 = vpow2.f32 %v778_v1  ;;  %v760_v53 = vsub.f32 %v1889_v17, %v743_v2  ;;  %v759_v17 = vsub.f32 %v1899_v14, %v741_v19 }
 0x335   :  { %1587 = vpow2.f32 %v782_v3 }
 0x336   :  { %v790_v0 = vmul.f32 1.442695, %v760_v53  ;;  %v788_v25 = vmul.f32 1.442695, %v759_v17 }
 0x337   :  { %v739_v8 = vpop.xlane.xlu1 %738 }
 0x338   :  { %v758_v13 = vsub.f32 %v1892_v20, %v739_v8 }
 0x33a   :  { %v786_v54 = vmul.f32 1.442695, %v758_v13 }
 0x33b   :  { %v413_v18 = vpop.permute.xlu1 %412 }
 0x33c   :  { %1589 = vpow2.f32 %v786_v54  ;;  %1474 = vmatprep.subr.bf16.mxu1 %v413_v18 }
 0x33d   :  { %1475 = vmatpush3.bf16.msra.mxu1 %v413_v18  ;;  %1591 = vpow2.f32 %v780_v15 }
 0x33e   :  { %v1954_v22 = vpop.eup %1585  ;;  %1593 = vpow2.f32 %v790_v0 }
 0x33f   :  { %810 = vadd.xlane.f32.xlu1 %v1954_v22  ;;  %v1958_v20 = vpop.eup %1587  ;;  %1595 = vpow2.f32 %v784_v16 }
 0x340   :  { %1597 = vpow2.f32 %v788_v25 }
 0x341   :  { %1599 = vpow2.f32 %v792_v27 }
 0x343   :  { %814 = vadd.xlane.f32.xlu1 %v1958_v20 }
 0x346   :  { %v1962_v26 = vpop.eup %1589 }
 0x347   :  { %818 = vadd.xlane.f32.xlu1 %v1962_v26  ;;  %v1965_v28 = vpop.eup %1591 }
 0x348   :  { %v1967_v29 = vpop.eup %1593 }
 0x349   :  { %v1971_v14 = vpop.eup %1595 }
 0x34a   :  { %v1974_v23 = vpop.eup %1597 }
 0x34b   :  { %822 = vadd.xlane.f32.xlu1 %v1967_v29  ;;  %812 = vadd.xlane.f32.xlu0 %v1965_v28  ;;  %v1977_v30 = vpop.eup %1599 }
 0x34f   :  { %816 = vadd.xlane.f32.xlu0 %v1971_v14 }
 0x353   :  { %820 = vadd.xlane.f32.xlu0 %v1974_v23 }
 0x357   :  { %824 = vadd.xlane.f32.xlu0 %v1977_v30 }
 0x35c   :  { %974 = vrot.lane.b32.xlu1 %v1984_v32, %s1658_s21 }
 0x360   :  { %978 = vrot.lane.b32.xlu1 %v1989_v33, %s1658_s21 }
 0x364   :  { %980 = vrot.lane.b32.xlu1 %v1994_v34, %s1658_s21 }
 0x368   :  { %1112 = vrot.lane.b32.xlu1 %v1999_v35, %s1657_s20 }
 0x36c   :  { %1116 = vrot.lane.b32.xlu1 %v1994_v34, %s1657_s20 }
 0x36d   :  { %976 = vrot.lane.b32.xlu0 %v1999_v35, %s1658_s21 }
 0x370   :  { %1193 = vrot.lane.b32.xlu1 %v1999_v35, %s1659_s22 }
 0x371   :  { %1110 = vrot.lane.b32.xlu0 %v1984_v32, %s1657_s20 }
 0x374   :  { %1197 = vrot.lane.b32.xlu1 %v1994_v34, %s1659_s22 }
 0x375   :  { %1114 = vrot.lane.b32.xlu0 %v1989_v33, %s1657_s20 }
 0x379   :  { %1191 = vrot.lane.b32.xlu0 %v1984_v32, %s1659_s22 }
 0x37d   :  { %1195 = vrot.lane.b32.xlu0 %v1989_v33, %s1659_s22 }
 0x387   :  { %v799_v9 = vpop.xlane.xlu1 %798 }
 0x38b   :  { %v795_v10 = vpop.xlane.xlu1 %794 }
 0x38c   :  { %1601 = vrcp.f32 %v795_v10 }
 0x38f   :  { %v801_v11 = vpop.xlane.xlu0 %800  ;;  %v419_v46 = vpop.permute.xlu1 %418 }
 0x393   :  { %v797_v12 = vpop.xlane.xlu0 %796  ;;  %v423_v49 = vpop.permute.xlu1 %422 }
 0x394   :  { %1603 = vrcp.f32 %v797_v12 }
 0x395   :  { %1605 = vrcp.f32 %v801_v11 }
 0x396   :  { %v1602_v40 = vpop.eup %1601 }
 0x397   :  { %v807_v36 = vpop.xlane.xlu0 %806  ;;  %v842_v43 = vmul.f32 %v1602_v40, %v1917_v37  ;;  %v425_v51 = vpop.permute.xlu1 %424 }
 0x39b   :  { %v803_v39 = vpop.xlane.xlu0 %802 }
 0x39e   :  { %v1604_v41 = vpop.eup %1603 }
 0x39f   :  { %v809_v5 = vpop.xlane.xlu0 %808  ;;  %v843_v24 = vmul.f32 %v1604_v41, %v1925_v45  ;;  %v1606_v50 = vpop.eup %1605 }
 0x3a0   :  { %v845_v58 = vmul.f32 %v1606_v50, %v1921_v47 }
 0x3a1   :  { %v858_v44 = vpack.c.bf16 %v843_v24, %v842_v43 }
 0x3a3   :  { %v805_v21 = vpop.xlane.xlu0 %804  ;;  %1484 = vmatprep.mubr.bf16.mxu1 %v858_v44 }
 0x3a4   :  { %1607 = vrcp.f32 %v805_v21 }
 0x3a5   :  { %1609 = vrcp.f32 %v799_v9 }
 0x3a6   :  { %1611 = vrcp.f32 %v803_v39 }
 0x3a7   :  { %v417_v38 = vpop.permute.xlu0 %416  ;;  %1613 = vrcp.f32 %v809_v5 }
 0x3a8   :  { %1476 = vmatprep.subr.bf16.mxu1 %v417_v38  ;;  %1615 = vrcp.f32 %v807_v36 }
 0x3a9   :  { %1477 = vmatpush3.bf16.msra.mxu1 %v417_v38 }
 0x3aa   :  { %1478 = vmatprep.subr.bf16.mxu1 %v419_v46 }
 0x3ad   :  { %1479 = vmatpush3.bf16.msra.mxu1 %v419_v46 }
 0x3ae   :  { %1480 = vmatprep.subr.bf16.mxu1 %v423_v49  ;;  %v1608_v37 = vpop.eup %1607 }
 0x3af   :  { %v1610_v45 = vpop.eup %1609  ;;  %v847_v59 = vmul.f32 %v1608_v37, %v1941_v56 }
 0x3b0   :  { %v1612_v57 = vpop.eup %1611  ;;  %v844_v60 = vmul.f32 %v1610_v45, %v1913_v42 }
 0x3b1   :  { %1481 = vmatpush3.bf16.msra.mxu1 %v423_v49  ;;  %v846_v62 = vmul.f32 %v1612_v57, %v1931_v55  ;;  %v1614_v1 = vpop.eup %1613 }
 0x3b2   :  { %1482 = vmatprep.subr.bf16.mxu1 %v425_v51  ;;  %v859_v63 = vpack.c.bf16 %v845_v58, %v844_v60  ;;  %v1616_v3 = vpop.eup %1615  ;;  %v849_v4 = vmul.f32 %v1614_v1, %v1936_v48  ;;  %v1209_v1 = vld [vmem:[%s2088_s2 + $0x4c] sm:$0xf] }
 0x3b3   :  { %v860_v2 = vpack.c.bf16 %v847_v59, %v846_v62  ;;  %v848_v7 = vmul.f32 %v1616_v3, %v1928_v52 }
 0x3b5   :  { %1483 = vmatpush3.bf16.msra.mxu1 %v425_v51  ;;  %v861_v8 = vpack.c.bf16 %v849_v4, %v848_v7 }
 0x3b8   :  { %1485 = vmatmul.mubr.bf16.vlgmr.msra.gmra.mrb[8].mxu1 %v859_v63 }
 0x3b9   :  { %1488 = vmatprep.mubr.bf16.mxu1 %v860_v2 }
 0x3c0   :  { %1489 = vmatmul.mubr.bf16.gmra.mrb[12].mxu1 %v861_v8 }
 0x3cc   :  { %v811_v47 = vpop.xlane.xlu1 %810 }
 0x3cd   :  { %1617 = vrcp.f32 %v811_v47 }
 0x3d0   :  { %v815_v53 = vpop.xlane.xlu1 %814 }
 0x3d4   :  { %v819_v42 = vpop.xlane.xlu1 %818 }
 0x3d7   :  { %v1618_v15 = vpop.eup %1617 }
 0x3d8   :  { %v813_v56 = vpop.xlane.xlu0 %812  ;;  %v823_v13 = vpop.xlane.xlu1 %822  ;;  %v850_v61 = vmul.f32 %v1618_v15, %v1954_v22 }
 0x3d9   :  { %1619 = vrcp.f32 %v813_v56 }
 0x3da   :  { %1621 = vrcp.f32 %v815_v53 }
 0x3dc   :  { %v817_v55 = vpop.xlane.xlu0 %816 }
 0x3dd   :  { %1623 = vrcp.f32 %v817_v55 }
 0x3de   :  { %1625 = vrcp.f32 %v819_v42 }
 0x3e0   :  { %v821_v54 = vpop.xlane.xlu0 %820 }
 0x3e1   :  { %1627 = vrcp.f32 %v821_v54 }
 0x3e2   :  { %1629 = vrcp.f32 %v823_v13 }
 0x3e3   :  { %v1620_v48 = vpop.eup %1619 }
 0x3e4   :  { %v825_v18 = vpop.xlane.xlu0 %824  ;;  %v1622_v52 = vpop.eup %1621  ;;  %v851_v0 = vmul.f32 %v1620_v48, %v1965_v28 }
 0x3e5   :  { %1631 = vrcp.f32 %v825_v18  ;;  %v852_v17 = vmul.f32 %v1622_v52, %v1958_v20 }
 0x3e6   :  { %v862_v16 = vpack.c.bf16 %v851_v0, %v850_v61  ;;  %v1217_v61 = vsel %vm999_vm10, %v1209_v1, 0 }
 0x3e7   :  { %v1624_v19 = vpop.eup %1623 }
 0x3e8   :  { %v853_v6 = vmul.f32 %v1624_v19, %v1971_v14  ;;  %v1626_v25 = vpop.eup %1625  ;;  %1492 = vmatprep.mubr.bf16.mxu1 %v862_v16  ;;  %v992_v14 = vld [vmem:[%s2088_s2 + $0x44] sm:$0xf]  ;;  %v977_v51 = vpop.permute.xlu0 %976 }
 0x3e9   :  { %v854_v9 = vmul.f32 %v1626_v25, %v1962_v26  ;;  %1544 = vmatprep.subr.msk.bf16.mxu1 %vm999_vm10, %v992_v14  ;;  %v1001_v26 = vsel %vm999_vm10, %v992_v14, 0 }
 0x3ea   :  { %v863_v27 = vpack.c.bf16 %v853_v6, %v852_v17  ;;  %1501 = vmatpush3.bf16.msra.mxu1 %v1001_v26 }
 0x3eb   :  { %v1628_v31 = vpop.eup %1627 }
 0x3ec   :  { %1493 = vmatmul.mubr.bf16.gmra.mrb[16].mxu1 %v863_v27  ;;  %v855_v10 = vmul.f32 %v1628_v31, %v1974_v23  ;;  %v1630_v11 = vpop.eup %1629  ;;  %v969_v23 = vld [vmem:[%s2088_s2 + $0x40] sm:$0xf]  ;;  %v1111_v3 = vpop.permute.xlu0 %1110 }
 0x3ed   :  { %v856_v28 = vmul.f32 %v1630_v11, %v1967_v29  ;;  %1545 = vmatprep.subr.msk.bf16.mxu1 %vm999_vm10, %v969_v23  ;;  %v975_v29 = vpop.permute.xlu1 %974  ;;  %v1059_v63 = vsel %vm999_vm10, %v969_v23, 0 }
 0x3ee   :  { %v864_v12 = vpack.c.bf16 %v855_v10, %v854_v9 }
 0x3ef   :  { %v1632_v22 = vpop.eup %1631 }
 0x3f0   :  { %1496 = vmatprep.mubr.bf16.mxu1 %v864_v12  ;;  %v857_v36 = vmul.f32 %v1632_v22, %v1977_v30  ;;  %v1115_v7 = vpop.permute.xlu0 %1114  ;;  %v1343_v22 = vld [vmem:[%s2089_s3 + $0x4] ss:$0 sm:$0xff]  ;;  %s1633_s3 = scalar_lea.vmem %s1291_s18, 512 }
 0x3f1   :  { %v979_v24 = vpop.permute.xlu1 %978  ;;  %p1634_p0 = scmp.ne.s32.totalorder %s1291_s18, %s1633_s3  ;;  %p1639_p2 = scmp.lt.s32.totalorder %s1633_s3, %s1633_s3 }
 0x3f2   :  { %v865_v20 = vpack.c.bf16 %v857_v36, %v856_v28 }
 0x3f3   :  { %p1640_p3 = por %p1639_p2, %p1638_p1 }
 0x3f4   :  { %1497 = vmatmul.mubr.bf16.gmra.mrb[20].mxu1 %v865_v20  ;;  %v1192_v54 = vpop.permute.xlu0 %1191 }
 0x3f5   :  { %v981_v37 = vpop.permute.xlu1 %980  ;;  %p1641_p4 = pnand %p1640_p3, %p1634_p0 }
 0x3f8   :  { %v1196_v17 = vpop.permute.xlu0 %1195 }
 0x3f9   :  { %v1113_v2 = vpop.permute.xlu1 %1112 }
 0x3fd   :  { %v1117_v4 = vpop.permute.xlu1 %1116 }
 0x401   :  { %v1194_v56 = vpop.permute.xlu1 %1193 }
 0x405   :  { %v1198_v19 = vpop.permute.xlu1 %1197 }
 0x48b   :  { %v1486_v30 = vpop.f32.mrb[8].mxu1 }
 0x48c   :  { %v900_v39 = vpop.f32.mrb[9].mxu1  ;;  %v965_v41 = vmul.f32 %v1486_v30, %v1989_v33 }
 0x48d   :  { %v1487_v40 = vpop.f32.mrb[10].mxu1  ;;  %v963_v44 = vmul.f32 %v900_v39, %v1984_v32  ;;  %v1128_v32 = vld [vmem:[%s2088_s2 + $0x48] sm:$0xf] }
 0x48e   :  { %v966_v5 = vmul.f32 %v1487_v40, %v1994_v34  ;;  %v903_v43 = vpop.f32.mrb[11].mxu1 }
 0x48f   :  { %v964_v21 = vmul.f32 %v903_v43, %v1999_v35  ;;  %v1136_v35 = vsel %vm999_vm10, %v1128_v32, 0 }
 0x490   :  { %v968_v46 = vpack.c.bf16 %v966_v5, %v965_v41 }
 0x491   :  { %v967_v38 = vpack.c.bf16 %v964_v21, %v963_v44 }
 0x493   :  { %v1490_v49 = vpop.f32.mrb[12].mxu1 }
 0x494   :  { %v916_v50 = vpop.f32.mrb[13].mxu1  ;;  %v988_v57 = vmul.f32 %v1490_v49, %v979_v24 }
 0x495   :  { %v1491_v45 = vpop.f32.mrb[14].mxu1  ;;  %v986_v60 = vmul.f32 %v975_v29, %v916_v50 }
 0x496   :  { %v989_v58 = vmul.f32 %v1491_v45, %v981_v37  ;;  %v919_v59 = vpop.f32.mrb[15].mxu1 }
 0x497   :  { %v987_v33 = vmul.f32 %v977_v51, %v919_v59 }
 0x498   :  { %v991_v62 = vpack.c.bf16 %v989_v58, %v988_v57 }
 0x499   :  { %v990_v34 = vpack.c.bf16 %v987_v33, %v986_v60 }
 0x49b   :  { %1502 = vmatprep.mubr.msk.bf16.mxu1 %vm428_vm1, %v990_v34 }
 0x49c   :  { %1503 = vmatmul.mubr.msk.bf16.vlgmr.msra.gmra.mrb[24].mxu1 %vm428_vm1, %v991_v62 }
 0x49d   :  { %1508 = vmatprep.mubr.msk.bf16.mxu1 %vm428_vm1, %v967_v38  ;;  %1507 = vmatpush3.bf16.msra.mxu1 %v1059_v63 }
 0x49e   :  { %1546 = vmatprep.subr.msk.bf16.mxu1 %vm999_vm10, %v1128_v32 }
 0x4a8   :  { %1509 = vmatmul.mubr.msk.bf16.vlgmr.msra.gmra.mrb[24].mxu1 %vm428_vm1, %v968_v46 }
 0x4a9   :  { %1513 = vmatpush3.bf16.msra.mxu1 %v1136_v35 }
 0x4aa   :  { %1547 = vmatprep.subr.msk.bf16.mxu1 %vm999_vm10, %v1209_v1 }
 0x4bf   :  { %v1494_v8 = vpop.f32.mrb[16].mxu1 }
 0x4c0   :  { %v932_v47 = vpop.f32.mrb[17].mxu1  ;;  %v1124_v42 = vmul.f32 %v1494_v8, %v1115_v7 }
 0x4c1   :  { %v1495_v53 = vpop.f32.mrb[18].mxu1  ;;  %v1122_v15 = vmul.f32 %v1111_v3, %v932_v47 }
 0x4c2   :  { %v1125_v55 = vmul.f32 %v1495_v53, %v1117_v4  ;;  %v935_v13 = vpop.f32.mrb[19].mxu1 }
 0x4c3   :  { %v1123_v48 = vmul.f32 %v1113_v2, %v935_v13 }
 0x4c4   :  { %v1127_v18 = vpack.c.bf16 %v1125_v55, %v1124_v42 }
 0x4c5   :  { %v1126_v52 = vpack.c.bf16 %v1123_v48, %v1122_v15 }
 0x4c7   :  { %v1498_v0 = vpop.f32.mrb[20].mxu1  ;;  %1514 = vmatprep.mubr.msk.bf16.mxu1 %vm428_vm1, %v1126_v52 }
 0x4c8   :  { %v948_v16 = vpop.f32.mrb[21].mxu1  ;;  %1515 = vmatmul.mubr.msk.bf16.vlgmr.msra.gmra.mrb[24].mxu1 %vm428_vm1, %v1127_v18  ;;  %v1205_v25 = vmul.f32 %v1498_v0, %v1196_v17 }
 0x4c9   :  { %1519 = vmatpush3.bf16.msra.mxu1 %v1217_v61  ;;  %v1499_v6 = vpop.f32.mrb[22].mxu1  ;;  %v1203_v9 = vmul.f32 %v1192_v54, %v948_v16 }
 0x4ca   :  { %v1206_v27 = vmul.f32 %v1499_v6, %v1198_v19  ;;  %v951_v31 = vpop.f32.mrb[23].mxu1 }
 0x4cb   :  { %v1204_v10 = vmul.f32 %v1194_v56, %v951_v31 }
 0x4cc   :  { %v1208_v11 = vpack.c.bf16 %v1206_v27, %v1205_v25 }
 0x4cd   :  { %v1207_v12 = vpack.c.bf16 %v1204_v10, %v1203_v9 }
 0x4cf   :  { %1520 = vmatprep.mubr.msk.bf16.mxu1 %vm428_vm1, %v1207_v12 }
 0x4d4   :  { %1521 = vmatmul.mubr.msk.bf16.vlgmr.msra.gmra.mrb[24].mxu1 %vm428_vm1, %v1208_v11 }
 0x5a7   :  { %v1522_v28 = vpop.f32.mrb[24].mxu1 }
 0x5a8   :  { %v1279_v36 = vadd.f32 %v1522_v28, %v1343_v22  ;;  %v1253_v20 = vpop.f32.mrb[25].mxu1 }
 0x5a9   :  { %v1277_v14 = vadd.f32 %v1343_v22, %v1253_v20  ;;  %v1523_v26 = vpop.f32.mrb[26].mxu1 }
 0x5aa   :  { %1283 = vst.msk [vmem:[#allocation2 + $0x10] sm:$0xff] %vm56_vm0, %v1279_v36  ;;  %v1280_v23 = vadd.f32 %v1523_v26, %v1343_v22  ;;  %v1256_v29 = vpop.f32.mrb[27].mxu1 }
 0x5ab   :  { %1281 = vst.msk [vmem:[#allocation2] sm:$0xff] %vm56_vm0, %v1277_v14  ;;  %v1278_v30 = vadd.f32 %v1343_v22, %v1256_v29 }
 0x5ac   :  { %1284 = vst.msk [vmem:[#allocation2 + $0x18] sm:$0xff] %vm56_vm0, %v1280_v23 }
 0x5ad   :  { %1282 = vst.msk [vmem:[#allocation2 + $0x8] sm:$0xff] %vm56_vm0, %v1278_v30 }
 0x5ae   :  { %1644 = shalt.err (!%p1641_p4)
}
 0x5af   :  { %s1645_s20 = scalar_lea.hbm %s2090_s4, 512 }
 0x5b0   :  { %p1646_p5 = scmp.ne.s32.totalorder %s2090_s4, %s1645_s20  ;;  %p1649_p6 = scmp.lt.u32.totalorder %s1645_s20, %s2090_s4 }
 0x5b2   :  { %p1651_p7 = pnand %p1649_p6, %p1646_p5 }
 0x5b4   :  { %1654 = shalt.err (!%p1651_p7)
}
 0x5b5   :  { %s1662_s25 = smov 128   ;;  %s1663_s26 = smov 8  }
 0x5b6   :  { %1296 = dma.vmem_to_hbm [thread:$0]  %s1291_s18, 512, %s2090_s4, [#allocation3], %s1662_s25, %s1662_s25, %s1663_s26  }
 0x5b7   :  { %1655 = dma.done.wait [#allocation3], 512  }
 0x5b8   :  { %1656 = vsyncadd [#allocation3], 4294966784 }
 0x5b9   :  { %1300 = vsyncpa [#allocation3], 1 }

</bundles_post_ra>
